<compile_context>
chip_gen: v5e
topology: v5e:2x2
jax: 0.10.0
libtpu: 0.0.40
codegen_flags: <defaults>
</compile_context>

<pallas_src>
import jax
import jax.numpy as jnp
from jax.experimental import pallas as pl
from jax.experimental.pallas import tpu as pltpu


def _round_up(a, m):
    return ((a + m - 1) // m) * m


def _pick_tile(rows, tn_req):
    """Row tile for one segment: multiple of 8, <= requested, fully inside the segment
    whenever the segment has >= 8 rows (ragged handling only on the last tile)."""
    cap = (rows // 8) * 8
    if cap == 0:
        cap = 8  # segment smaller than one sublane tile; kernel masks the extra rows
    return max(8, min(max(tn_req, 8) // 8 * 8, cap))


def _make_kernel(tiles_c, n_tiles, rows_c, rows_k, tn_c, tn_k):
    """Kernel factory: captures Python ints only (no traced constants)."""

    def kernel(xc_ref, xk_ref, w_ref, b_ref, yc_ref, yk_ref, out_ref,
               acc_num, acc_den):
        i = pl.program_id(0)

        @pl.when(i == 0)
        def _init():
            acc_num[...] = jnp.zeros_like(acc_num)
            acc_den[...] = jnp.zeros_like(acc_den)

        def accumulate(x_tile, y_tile, local_i, seg_rows, tn):
            # Rows past the end of this segment (ragged last tile) are zeroed so the
            # matmul stays finite; their labels were padded with class 0 (weight 0),
            # so they contribute nothing to the accumulators.
            rid = jax.lax.broadcasted_iota(jnp.int32, (tn, 1), 0) + local_i * tn
            valid = rid < seg_rows                                    # (tn, 1) bool
            x = jnp.where(valid, x_tile, jnp.zeros_like(x_tile))      # bf16

            # Logits in f32 (MXU, f32 accumulate). Bias is VMEM-resident f32, and
            # -1e30 on padded classes so exp underflows to exactly 0 in the LSE.
            logits = jnp.dot(x, w_ref[...],
                             preferred_element_type=jnp.float32) + b_ref[...]
            m = jnp.max(logits, axis=-1, keepdims=True)               # (tn, 1)
            lse = jnp.log(jnp.sum(jnp.exp(logits - m), axis=-1, keepdims=True)) + m

            y = y_tile                                                # (tn, 1) int32
            col = jax.lax.broadcasted_iota(jnp.int32, logits.shape, 1)
            true_logit = jnp.sum(jnp.where(col == y, logits, 0.0),
                                 axis=-1, keepdims=True)              # (tn, 1)
            nll = lse - true_logit

            # CrossEntropyLoss(weight=w), w = ones with w[0] = 0  =>  weight = (y != 0).
            sample_w = jnp.logical_and(y != 0, valid).astype(jnp.float32)

            # Sublane-aligned static sub-slab of the shared accumulators.
            acc_num[:tn, :] += sample_w * nll
            acc_den[:tn, :] += sample_w

        @pl.when(i < tiles_c)
        def _cand():
            accumulate(xc_ref[...], yc_ref[...], i, rows_c, tn_c)

        @pl.when(i >= tiles_c)
        def _clicked():
            accumulate(xk_ref[...], yk_ref[...], i - tiles_c, rows_k, tn_k)

        @pl.when(i == n_tiles - 1)
        def _finalize():
            num = jnp.sum(acc_num[...], axis=0, keepdims=True)        # (1, 1)
            den = jnp.sum(acc_den[...], axis=0, keepdims=True)        # (1, 1)
            # TODO(synk): den == 0 (every label is class 0) yields NaN, matching
            # PyTorch CrossEntropyLoss(weight=...) semantics; no clamping applied.
            out_ref[...] = num / den

    return kernel


def topic_prediction_loss(values, params, *, weight=0.2, tn=512):
    """Pure-JAX wrapper reproducing TopicPredictionLoss.forward via one Pallas call."""
    cand_vec = values['candidate_news_vectors']      # (B, Nc, D)
    click_vec = values['clicked_news_vectors']       # (B, Nk, D)
    cand_cat = values['candidate_news']['category']  # (B, Nc) int
    click_cat = values['clicked_news']['category']   # (B, Nk) int

    B, Nc, D = cand_vec.shape
    Nk = click_vec.shape[1]
    W = params['W']                                   # (C, D)
    b = params['b']                                   # (C,)
    C = W.shape[0]

    rows_c = B * Nc
    rows_k = B * Nk

    # Independent row tiles per segment (multiples of 8 sublanes).
    tn_c = _pick_tile(rows_c, tn)
    tn_k = _pick_tile(rows_k, tn)
    tn_max = max(tn_c, tn_k)
    tiles_c = pl.cdiv(rows_c, tn_c)
    tiles_k = pl.cdiv(rows_k, tn_k)
    n_tiles = tiles_c + tiles_k

    # Activations: reshape only (free) + bf16 cast for the MXU. No (N, D) concat in HBM.
    xc = cand_vec.reshape(rows_c, D).astype(jnp.bfloat16)
    xk = click_vec.reshape(rows_k, D).astype(jnp.bfloat16)

    # Labels with the exact PyTorch pairing: the reference pairs row r of the
    # batch-interleaved tensor [b0 cand, b0 clicked, b1 cand, ...] with element r of
    # the concatenated label vector [all cand cats, all clicked cats].  The kernel
    # walks rows as [all cand rows, all clicked rows], so gather the labels through
    # the same permutation (kernel row -> original flat position).
    y_orig = jnp.concatenate(
        [cand_cat.reshape(-1), click_cat.reshape(-1)]).astype(jnp.int32)
    pc = jnp.arange(rows_c, dtype=jnp.int32)
    sig_c = (pc // Nc) * (Nc + Nk) + (pc % Nc)
    pk = jnp.arange(rows_k, dtype=jnp.int32)
    sig_k = (pk // Nk) * (Nc + Nk) + Nc + (pk % Nk)
    # Pad with class 0 (weight 0) so padded label rows contribute nothing.
    yc = jnp.pad(y_orig[sig_c], (0, tiles_c * tn_c - rows_c)).reshape(-1, 1)
    yk = jnp.pad(y_orig[sig_k], (0, tiles_k * tn_k - rows_k)).reshape(-1, 1)

    # Classifier padded to 128 lanes: zero weight columns + -1e30 bias on padded
    # classes -> all lane reductions / stores are full-width and unmasked.
    c_pad = _round_up(max(C, 128), 128)
    w_pad = jnp.zeros((D, c_pad), jnp.bfloat16).at[:, :C].set(W.T.astype(jnp.bfloat16))
    b_pad = jnp.full((1, c_pad), -1e30, jnp.float32).at[0, :C].set(
        b.astype(jnp.float32))

    kernel = _make_kernel(tiles_c, n_tiles, rows_c, rows_k, tn_c, tn_k)

    out = pl.pallas_call(
        kernel,
        out_shape=jax.ShapeDtypeStruct((1, 1), jnp.float32),
        grid=(n_tiles,),
        in_specs=[
            # Clamped index maps: while one segment streams, the other segment's block
            # index stays constant, so Pallas does not re-fetch it.
            pl.BlockSpec((tn_c, D), lambda i: (jnp.minimum(i, tiles_c - 1), 0)),
            pl.BlockSpec((tn_k, D), lambda i: (jnp.maximum(i - tiles_c, 0), 0)),
            pl.BlockSpec((D, c_pad), lambda i: (0, 0)),    # resident weights
            pl.BlockSpec((1, c_pad), lambda i: (0, 0)),    # resident bias
            pl.BlockSpec((tn_c, 1), lambda i: (jnp.minimum(i, tiles_c - 1), 0)),
            pl.BlockSpec((tn_k, 1), lambda i: (jnp.maximum(i - tiles_c, 0), 0)),
        ],
        out_specs=pl.BlockSpec((1, 1), lambda i: (0, 0)),
        scratch_shapes=[pltpu.VMEM((tn_max, 1), jnp.float32),
                        pltpu.VMEM((tn_max, 1), jnp.float32)],
        compiler_params=pltpu.CompilerParams(
            dimension_semantics=("arbitrary",)),
    )(xc, xk, w_pad, b_pad, yc, yk)

    # Loss-weight scale applied here so the kernel captures no traced constants.
    return weight * out[0, 0]


def _reference_loss(values, params, *, weight=0.2):
    """Plain-JAX (f32) reference mirroring the PyTorch module exactly."""
    cand_vec = values['candidate_news_vectors']
    click_vec = values['clicked_news_vectors']
    cand_cat = values['candidate_news']['category']
    click_cat = values['clicked_news']['category']
    D = cand_vec.shape[-1]
    x = jnp.concatenate((cand_vec, click_vec), axis=1).reshape(-1, D)
    y = jnp.concatenate((cand_cat.reshape(-1), click_cat.reshape(-1))).astype(jnp.int32)
    logits = x @ params['W'].T + params['b']
    logp = jax.nn.log_softmax(logits, axis=-1)
    C = logits.shape[-1]
    cw = jnp.ones((C,), jnp.float32).at[0].set(0.0)
    sw = cw[y]
    nll = -jnp.take_along_axis(logp, y[:, None], axis=-1)[:, 0]
    return weight * jnp.sum(sw * nll) / jnp.sum(sw)


if __name__ == "__main__":
    # Small, module-consistent shapes.  Nk > Nc exercises unequal per-segment tiles,
    # ragged last tiles and the masked-row path.
    B, Nc, Nk = 2, 4, 9           # batch, candidate news, clicked news
    D = 32                        # news_embedding_dim
    C = 5                         # num_categories

    key = jax.random.PRNGKey(0)
    k1, k2, k3, k4, k5, k6 = jax.random.split(key, 6)

    values = {
        'candidate_news_vectors': jax.random.normal(k1, (B, Nc, D), jnp.float32),
        'clicked_news_vectors':   jax.random.normal(k2, (B, Nk, D), jnp.float32),
        'candidate_news': {'category': jax.random.randint(k3, (B, Nc), 0, C)},
        'clicked_news':   {'category': jax.random.randint(k4, (B, Nk), 0, C)},
    }
    # Deterministic parameter init (nn.Linear(D, C) shapes): W (C, D), b (C,)
    params = {
        'W': 0.1 * jax.random.normal(k5, (C, D), jnp.float32),
        'b': 0.1 * jax.random.normal(k6, (C,), jnp.float32),
    }

    # tn=16: candidate segment uses tn_c=8 (1 tile), clicked uses tn_k=16 (2 tiles,
    # second one ragged) -> 3-step grid with unequal tiles.
    loss = topic_prediction_loss(values, params, weight=0.2, tn=16)
    loss = jax.block_until_ready(loss)

    ref = _reference_loss(values, params, weight=0.2)
    assert jnp.isfinite(loss), loss
    # Kernel matmul path is bf16 (f32 accumulate); compare to the f32 reference loosely.
    assert jnp.allclose(loss, ref, rtol=2e-2, atol=2e-2), (loss, ref)

    print("KERNEL_OK")
</pallas_src>

<mosaic_0001>
module attributes {stable_mosaic.version = 11 : i64} {
  func.func @kernel(%arg0: i32, %arg1: memref<8x32xbf16, #tpu.memory_space<vmem>>, %arg2: memref<16x32xbf16, #tpu.memory_space<vmem>>, %arg3: memref<32x128xbf16, #tpu.memory_space<vmem>>, %arg4: memref<1x128xf32, #tpu.memory_space<vmem>>, %arg5: memref<8x1xi32, #tpu.memory_space<vmem>>, %arg6: memref<16x1xi32, #tpu.memory_space<vmem>>, %arg7: memref<1x1xf32, #tpu.memory_space<vmem>>, %arg8: memref<16x1xf32, #tpu.memory_space<vmem>>, %arg9: memref<16x1xf32, #tpu.memory_space<vmem>>) attributes {dimension_semantics = [#tpu.dimension_semantics<arbitrary>], iteration_bounds = array<i64: 3>, scalar_prefetch = 0 : i64, scratch_operands = 2 : i64, tpu.core_type = #tpu.core_type<tc>, window_params = [{transform_indices = @transform_0, window_bounds = array<i64: 8, 32>}, {transform_indices = @transform_1, window_bounds = array<i64: 16, 32>}, {pipeline_mode = #tpu.pipeline_mode<synchronous>, transform_indices = @transform_2, window_bounds = array<i64: 32, 128>}, {pipeline_mode = #tpu.pipeline_mode<synchronous>, transform_indices = @transform_3, window_bounds = array<i64: 1, 128>}, {transform_indices = @transform_4, window_bounds = array<i64: 8, 1>}, {transform_indices = @transform_5, window_bounds = array<i64: 16, 1>}, {pipeline_mode = #tpu.pipeline_mode<synchronous>, transform_indices = @transform_6, window_bounds = array<i64: 1, 1>}]} {
    %c0_i32 = arith.constant 0 : i32
    %0 = arith.cmpi eq, %arg0, %c0_i32 : i32
    %1 = arith.extui %0 : i1 to i32
    %c0_i32_0 = arith.constant 0 : i32
    %2 = arith.cmpi ne, %1, %c0_i32_0 : i32
    scf.if %2 {
      %cst = arith.constant 0.000000e+00 : f32
      %12 = vector.broadcast %cst : f32 to vector<16x1xf32>
      %c0 = arith.constant 0 : index
      %c0_5 = arith.constant 0 : index
      %13 = vector.load %arg8[%c0, %c0_5] : memref<16x1xf32, #tpu.memory_space<vmem>>, vector<16x1xf32>
      tpu.vector_store %arg8[%c0, %c0_5], %12 {strides = array<i32>} : memref<16x1xf32, #tpu.memory_space<vmem>>, vector<16x1xf32>,
      %cst_6 = arith.constant 0.000000e+00 : f32
      %14 = vector.broadcast %cst_6 : f32 to vector<16x1xf32>
      %c0_7 = arith.constant 0 : index
      %c0_8 = arith.constant 0 : index
      %15 = vector.load %arg9[%c0_7, %c0_8] : memref<16x1xf32, #tpu.memory_space<vmem>>, vector<16x1xf32>
      tpu.vector_store %arg9[%c0_7, %c0_8], %14 {strides = array<i32>} : memref<16x1xf32, #tpu.memory_space<vmem>>, vector<16x1xf32>,
    } else {
    }
    %c1_i32 = arith.constant 1 : i32
    %3 = arith.cmpi slt, %arg0, %c1_i32 : i32
    %4 = arith.extui %3 : i1 to i32
    %c0_i32_1 = arith.constant 0 : i32
    %5 = arith.cmpi ne, %4, %c0_i32_1 : i32
    scf.if %5 {
      %c0 = arith.constant 0 : index
      %c0_5 = arith.constant 0 : index
      %12 = vector.load %arg1[%c0, %c0_5] : memref<8x32xbf16, #tpu.memory_space<vmem>>, vector<8x32xbf16>
      %c0_6 = arith.constant 0 : index
      %c0_7 = arith.constant 0 : index
      %13 = vector.load %arg5[%c0_6, %c0_7] : memref<8x1xi32, #tpu.memory_space<vmem>>, vector<8x1xi32>
      %14 = tpu.iota {dimensions = array<i32: 0>} : vector<8x1xi32>
      %c8_i32 = arith.constant 8 : i32
      %15 = arith.muli %arg0, %c8_i32 : i32
      %16 = vector.broadcast %15 : i32 to vector<8x1xi32>
      %17 = arith.addi %14, %16 : vector<8x1xi32>
      %c8_i32_8 = arith.constant 8 : i32
      %18 = vector.broadcast %c8_i32_8 : i32 to vector<8x1xi32>
      %19 = arith.cmpi slt, %17, %18 : vector<8x1xi32>
      %cst = arith.constant 0.000000e+00 : bf16
      %20 = vector.broadcast %cst : bf16 to vector<8x32xbf16>
      %21 = vector.shape_cast %19 : vector<8x1xi1> to vector<8x1xi1>
      %22 = vector.broadcast %21 : vector<8x1xi1> to vector<8x32xi1>
      %23 = arith.select %22, %12, %20 : vector<8x32xi1>, vector<8x32xbf16>
      %c0_9 = arith.constant 0 : index
      %c0_10 = arith.constant 0 : index
      %24 = vector.load %arg3[%c0_9, %c0_10] : memref<32x128xbf16, #tpu.memory_space<vmem>>, vector<32x128xbf16>
      %cst_11 = arith.constant dense<0.000000e+00> : vector<8x128xf32>
      %25 = tpu.matmul %23, %24, %cst_11 {dimension_numbers = #tpu.dot_dimension_numbers<[1], [0], [0], [1], [0, 0, 1, 1], [], []>} : vector<8x32xbf16>, vector<32x128xbf16>, vector<8x128xf32> -> vector<8x128xf32>
      %c0_12 = arith.constant 0 : index
      %c0_13 = arith.constant 0 : index
      %26 = vector.load %arg4[%c0_12, %c0_13] : memref<1x128xf32, #tpu.memory_space<vmem>>, vector<1x128xf32>
      %27 = vector.broadcast %26 : vector<1x128xf32> to vector<8x128xf32>
      %28 = arith.addf %25, %27 : vector<8x128xf32>
      %cst_14 = arith.constant dense<0xFF800000> : vector<8xf32>
      %29 = vector.multi_reduction <maximumf>, %28, %cst_14 [1] : vector<8x128xf32> to vector<8xf32>
      %30 = vector.shape_cast %29 : vector<8xf32> to vector<8x1xf32>
      %31 = vector.broadcast %30 : vector<8x1xf32> to vector<8x128xf32>
      %32 = arith.subf %28, %31 : vector<8x128xf32>
      %33 = math.exp %32 : vector<8x128xf32>
      %cst_15 = arith.constant dense<0.000000e+00> : vector<8xf32>
      %34 = vector.multi_reduction <add>, %33, %cst_15 [1] : vector<8x128xf32> to vector<8xf32>
      %35 = vector.shape_cast %34 : vector<8xf32> to vector<8x1xf32>
      %36 = math.log %35 : vector<8x1xf32>
      %37 = arith.addf %36, %30 : vector<8x1xf32>
      %38 = tpu.iota {dimensions = array<i32: 1>} : vector<8x128xi32>
      %39 = vector.broadcast %13 : vector<8x1xi32> to vector<8x128xi32>
      %40 = arith.cmpi eq, %38, %39 : vector<8x128xi32>
      %cst_16 = arith.constant 0.000000e+00 : f32
      %41 = vector.broadcast %cst_16 : f32 to vector<8x128xf32>
      %42 = arith.select %40, %28, %41 : vector<8x128xi1>, vector<8x128xf32>
      %cst_17 = arith.constant dense<0.000000e+00> : vector<8xf32>
      %43 = vector.multi_reduction <add>, %42, %cst_17 [1] : vector<8x128xf32> to vector<8xf32>
      %44 = vector.shape_cast %43 : vector<8xf32> to vector<8x1xf32>
      %45 = arith.subf %37, %44 : vector<8x1xf32>
      %c0_i32_18 = arith.constant 0 : i32
      %46 = vector.broadcast %c0_i32_18 : i32 to vector<8x1xi32>
      %47 = arith.cmpi ne, %13, %46 : vector<8x1xi32>
      %48 = arith.andi %47, %19 : vector<8x1xi1>
      %49 = arith.extui %48 : vector<8x1xi1> to vector<8x1xi32>
      %50 = arith.sitofp %49 : vector<8x1xi32> to vector<8x1xf32>
      %c0_19 = arith.constant 0 : index
      %c0_20 = arith.constant 0 : index
      %51 = vector.load %arg8[%c0_19, %c0_20] : memref<16x1xf32, #tpu.memory_space<vmem>>, vector<8x1xf32>
      %52 = arith.mulf %50, %45 : vector<8x1xf32>
      %53 = arith.addf %51, %52 : vector<8x1xf32>
      %c0_21 = arith.constant 0 : index
      %c0_22 = arith.constant 0 : index
      %54 = vector.load %arg8[%c0_21, %c0_22] : memref<16x1xf32, #tpu.memory_space<vmem>>, vector<8x1xf32>
      tpu.vector_store %arg8[%c0_21, %c0_22], %53 {strides = array<i32>} : memref<16x1xf32, #tpu.memory_space<vmem>>, vector<8x1xf32>,
      %c0_23 = arith.constant 0 : index
      %c0_24 = arith.constant 0 : index
      %55 = vector.load %arg9[%c0_23, %c0_24] : memref<16x1xf32, #tpu.memory_space<vmem>>, vector<8x1xf32>
      %56 = arith.addf %55, %50 : vector<8x1xf32>
      %c0_25 = arith.constant 0 : index
      %c0_26 = arith.constant 0 : index
      %57 = vector.load %arg9[%c0_25, %c0_26] : memref<16x1xf32, #tpu.memory_space<vmem>>, vector<8x1xf32>
      tpu.vector_store %arg9[%c0_25, %c0_26], %56 {strides = array<i32>} : memref<16x1xf32, #tpu.memory_space<vmem>>, vector<8x1xf32>,
    } else {
    }
    %c1_i32_2 = arith.constant 1 : i32
    %6 = arith.cmpi sge, %arg0, %c1_i32_2 : i32
    %7 = arith.extui %6 : i1 to i32
    %c0_i32_3 = arith.constant 0 : i32
    %8 = arith.cmpi ne, %7, %c0_i32_3 : i32
    scf.if %8 {
      %c0 = arith.constant 0 : index
      %c0_5 = arith.constant 0 : index
      %12 = vector.load %arg2[%c0, %c0_5] : memref<16x32xbf16, #tpu.memory_space<vmem>>, vector<16x32xbf16>
      %c0_6 = arith.constant 0 : index
      %c0_7 = arith.constant 0 : index
      %13 = vector.load %arg6[%c0_6, %c0_7] : memref<16x1xi32, #tpu.memory_space<vmem>>, vector<16x1xi32>
      %c1_i32_8 = arith.constant 1 : i32
      %14 = arith.subi %arg0, %c1_i32_8 : i32
      %15 = tpu.iota {dimensions = array<i32: 0>} : vector<16x1xi32>
      %c16_i32 = arith.constant 16 : i32
      %16 = arith.muli %14, %c16_i32 : i32
      %17 = vector.broadcast %16 : i32 to vector<16x1xi32>
      %18 = arith.addi %15, %17 : vector<16x1xi32>
      %c18_i32 = arith.constant 18 : i32
      %19 = vector.broadcast %c18_i32 : i32 to vector<16x1xi32>
      %20 = arith.cmpi slt, %18, %19 : vector<16x1xi32>
      %cst = arith.constant 0.000000e+00 : bf16
      %21 = vector.broadcast %cst : bf16 to vector<16x32xbf16>
      %22 = vector.shape_cast %20 : vector<16x1xi1> to vector<16x1xi1>
      %23 = vector.broadcast %22 : vector<16x1xi1> to vector<16x32xi1>
      %24 = arith.select %23, %12, %21 : vector<16x32xi1>, vector<16x32xbf16>
      %c0_9 = arith.constant 0 : index
      %c0_10 = arith.constant 0 : index
      %25 = vector.load %arg3[%c0_9, %c0_10] : memref<32x128xbf16, #tpu.memory_space<vmem>>, vector<32x128xbf16>
      %cst_11 = arith.constant dense<0.000000e+00> : vector<16x128xf32>
      %26 = tpu.matmul %24, %25, %cst_11 {dimension_numbers = #tpu.dot_dimension_numbers<[1], [0], [0], [1], [0, 0, 1, 1], [], []>} : vector<16x32xbf16>, vector<32x128xbf16>, vector<16x128xf32> -> vector<16x128xf32>
      %c0_12 = arith.constant 0 : index
      %c0_13 = arith.constant 0 : index
      %27 = vector.load %arg4[%c0_12, %c0_13] : memref<1x128xf32, #tpu.memory_space<vmem>>, vector<1x128xf32>
      %28 = vector.broadcast %27 : vector<1x128xf32> to vector<16x128xf32>
      %29 = arith.addf %26, %28 : vector<16x128xf32>
      %cst_14 = arith.constant dense<0xFF800000> : vector<16xf32>
      %30 = vector.multi_reduction <maximumf>, %29, %cst_14 [1] : vector<16x128xf32> to vector<16xf32>
      %31 = vector.shape_cast %30 : vector<16xf32> to vector<16x1xf32>
      %32 = vector.broadcast %31 : vector<16x1xf32> to vector<16x128xf32>
      %33 = arith.subf %29, %32 : vector<16x128xf32>
      %34 = math.exp %33 : vector<16x128xf32>
      %cst_15 = arith.constant dense<0.000000e+00> : vector<16xf32>
      %35 = vector.multi_reduction <add>, %34, %cst_15 [1] : vector<16x128xf32> to vector<16xf32>
      %36 = vector.shape_cast %35 : vector<16xf32> to vector<16x1xf32>
      %37 = math.log %36 : vector<16x1xf32>
      %38 = arith.addf %37, %31 : vector<16x1xf32>
      %39 = tpu.iota {dimensions = array<i32: 1>} : vector<16x128xi32>
      %40 = vector.broadcast %13 : vector<16x1xi32> to vector<16x128xi32>
      %41 = arith.cmpi eq, %39, %40 : vector<16x128xi32>
      %cst_16 = arith.constant 0.000000e+00 : f32
      %42 = vector.broadcast %cst_16 : f32 to vector<16x128xf32>
      %43 = arith.select %41, %29, %42 : vector<16x128xi1>, vector<16x128xf32>
      %cst_17 = arith.constant dense<0.000000e+00> : vector<16xf32>
      %44 = vector.multi_reduction <add>, %43, %cst_17 [1] : vector<16x128xf32> to vector<16xf32>
      %45 = vector.shape_cast %44 : vector<16xf32> to vector<16x1xf32>
      %46 = arith.subf %38, %45 : vector<16x1xf32>
      %c0_i32_18 = arith.constant 0 : i32
      %47 = vector.broadcast %c0_i32_18 : i32 to vector<16x1xi32>
      %48 = arith.cmpi ne, %13, %47 : vector<16x1xi32>
      %49 = arith.andi %48, %20 : vector<16x1xi1>
      %50 = arith.extui %49 : vector<16x1xi1> to vector<16x1xi32>
      %51 = arith.sitofp %50 : vector<16x1xi32> to vector<16x1xf32>
      %c0_19 = arith.constant 0 : index
      %c0_20 = arith.constant 0 : index
      %52 = vector.load %arg8[%c0_19, %c0_20] : memref<16x1xf32, #tpu.memory_space<vmem>>, vector<16x1xf32>
      %53 = arith.mulf %51, %46 : vector<16x1xf32>
      %54 = arith.addf %52, %53 : vector<16x1xf32>
      %c0_21 = arith.constant 0 : index
      %c0_22 = arith.constant 0 : index
      %55 = vector.load %arg8[%c0_21, %c0_22] : memref<16x1xf32, #tpu.memory_space<vmem>>, vector<16x1xf32>
      tpu.vector_store %arg8[%c0_21, %c0_22], %54 {strides = array<i32>} : memref<16x1xf32, #tpu.memory_space<vmem>>, vector<16x1xf32>,
      %c0_23 = arith.constant 0 : index
      %c0_24 = arith.constant 0 : index
      %56 = vector.load %arg9[%c0_23, %c0_24] : memref<16x1xf32, #tpu.memory_space<vmem>>, vector<16x1xf32>
      %57 = arith.addf %56, %51 : vector<16x1xf32>
      %c0_25 = arith.constant 0 : index
      %c0_26 = arith.constant 0 : index
      %58 = vector.load %arg9[%c0_25, %c0_26] : memref<16x1xf32, #tpu.memory_space<vmem>>, vector<16x1xf32>
      tpu.vector_store %arg9[%c0_25, %c0_26], %57 {strides = array<i32>} : memref<16x1xf32, #tpu.memory_space<vmem>>, vector<16x1xf32>,
    } else {
    }
    %c2_i32 = arith.constant 2 : i32
    %9 = arith.cmpi eq, %arg0, %c2_i32 : i32
    %10 = arith.extui %9 : i1 to i32
    %c0_i32_4 = arith.constant 0 : i32
    %11 = arith.cmpi ne, %10, %c0_i32_4 : i32
    scf.if %11 {
      %c0 = arith.constant 0 : index
      %c0_5 = arith.constant 0 : index
      %12 = vector.load %arg8[%c0, %c0_5] : memref<16x1xf32, #tpu.memory_space<vmem>>, vector<16x1xf32>
      %cst = arith.constant dense<0.000000e+00> : vector<1xf32>
      %13 = vector.multi_reduction <add>, %12, %cst [0] : vector<16x1xf32> to vector<1xf32>
      %14 = vector.shape_cast %13 : vector<1xf32> to vector<1x1xf32>
      %c0_6 = arith.constant 0 : index
      %c0_7 = arith.constant 0 : index
      %15 = vector.load %arg9[%c0_6, %c0_7] : memref<16x1xf32, #tpu.memory_space<vmem>>, vector<16x1xf32>
      %cst_8 = arith.constant dense<0.000000e+00> : vector<1xf32>
      %16 = vector.multi_reduction <add>, %15, %cst_8 [0] : vector<16x1xf32> to vector<1xf32>
      %17 = vector.shape_cast %16 : vector<1xf32> to vector<1x1xf32>
      %18 = arith.divf %14, %17 : vector<1x1xf32>
      %c0_9 = arith.constant 0 : index
      %c0_10 = arith.constant 0 : index
      %19 = vector.load %arg7[%c0_9, %c0_10] : memref<1x1xf32, #tpu.memory_space<vmem>>, vector<1x1xf32>
      tpu.vector_store %arg7[%c0_9, %c0_10], %18 {strides = array<i32>} : memref<1x1xf32, #tpu.memory_space<vmem>>, vector<1x1xf32>,
    } else {
    }
    return
  }
  func.func @transform_0(%arg0: i32) -> (i32, i32) {
    %c0_i32 = arith.constant 0 : i32
    %0 = arith.minsi %arg0, %c0_i32 : i32
    %c0_i32_0 = arith.constant 0 : i32
    %c0_i32_1 = arith.constant 0 : i32
    return %0, %c0_i32_0 : i32, i32
  }
  func.func @transform_1(%arg0: i32) -> (i32, i32) {
    %c1_i32 = arith.constant 1 : i32
    %0 = arith.subi %arg0, %c1_i32 : i32
    %c0_i32 = arith.constant 0 : i32
    %1 = arith.maxsi %0, %c0_i32 : i32
    %c0_i32_0 = arith.constant 0 : i32
    %c0_i32_1 = arith.constant 0 : i32
    return %1, %c0_i32_0 : i32, i32
  }
  func.func @transform_2(%arg0: i32) -> (i32, i32) {
    %c0_i32 = arith.constant 0 : i32
    %c0_i32_0 = arith.constant 0 : i32
    %c0_i32_1 = arith.constant 0 : i32
    return %c0_i32, %c0_i32_0 : i32, i32
  }
  func.func @transform_3(%arg0: i32) -> (i32, i32) {
    %c0_i32 = arith.constant 0 : i32
    %c0_i32_0 = arith.constant 0 : i32
    %c0_i32_1 = arith.constant 0 : i32
    return %c0_i32, %c0_i32_0 : i32, i32
  }
  func.func @transform_4(%arg0: i32) -> (i32, i32) {
    %c0_i32 = arith.constant 0 : i32
    %0 = arith.minsi %arg0, %c0_i32 : i32
    %c0_i32_0 = arith.constant 0 : i32
    %c0_i32_1 = arith.constant 0 : i32
    return %0, %c0_i32_0 : i32, i32
  }
  func.func @transform_5(%arg0: i32) -> (i32, i32) {
    %c1_i32 = arith.constant 1 : i32
    %0 = arith.subi %arg0, %c1_i32 : i32
    %c0_i32 = arith.constant 0 : i32
    %1 = arith.maxsi %0, %c0_i32 : i32
    %c0_i32_0 = arith.constant 0 : i32
    %c0_i32_1 = arith.constant 0 : i32
    return %1, %c0_i32_0 : i32, i32
  }
  func.func @transform_6(%arg0: i32) -> (i32, i32) {
    %c0_i32 = arith.constant 0 : i32
    %c0_i32_0 = arith.constant 0 : i32
    %c0_i32_1 = arith.constant 0 : i32
    return %c0_i32, %c0_i32_0 : i32, i32
  }
}

</mosaic_0001>

<bundles_post_ra>
// kernel: tpu_custom_call.1
= control target key start
LH: loop header
LB: loop body
LE: loop exit
PB: predicated region body
PF: predicated region fallthrough
CT: control target
= control target key end

     0   :  { %11 = vsyncpa [#allocation5], 0  ;;  %s917_s21 = smov 0   ;;  %s995_s0 = inlined_call_operand.vmem [shape: bf16[8,32], index: 0, kind: input, shape index: {}]   ;;  %s996_s1 = inlined_call_operand.vmem [shape: bf16[18,32], index: 1, kind: input, shape index: {}]   ;;  %s997_s2 = inlined_call_operand.vmem [shape: bf16[32,128], index: 2, kind: input, shape index: {}]   ;;  %s998_s3 = inlined_call_operand.vmem [shape: f32[1,128], index: 3, kind: input, shape index: {}]   ;;  %s999_s4 = inlined_call_operand.vmem [shape: s32[8,1], index: 4, kind: input, shape index: {}]   ;;  %s1000_s5 = inlined_call_operand.vmem [shape: s32[32,1], index: 5, kind: input, shape index: {}]   ;;  %s1001_s6 = inlined_call_operand.hbm [shape: f32[1,1], index: 6, kind: output, shape index: {}]  }
   0x1 LB: > { %s923_s22 = sadd.s32 4294967295, %s874_s21   ;;  %p746_p0 = scmp.ge.s32.totalorder %s874_s21, 1  ;;  %s874_s21 = sphi %s917_s21, %s17_s21  }
   0x2   : > { %p286_p1 = scmp.lt.s32.totalorder %s874_s21, 4 }
   0x4   : > { %p287_p2 = pnand %p746_p0, %p286_p1 }
   0x5   : > { %p338_p3 = scmp.lt.s32.totalorder (!%p287_p2), %s923_s22, 0  ;;  %s929_s23 = sadd.s32 (!%p287_p2), 4294967295, %s923_s22 }
   0x6   : > { %290 = sbr.rel (%p287_p2) target bundleno = 904 (0x388), region = 44  ;;  %p347_p4 = scmp.gt.s32.totalorder (!%p287_p2), %s929_s23, 0 }
   0x7   : > { %p761_p7 = scmp.ne.s32.totalorder (!%p287_p2), %s923_s22, 0 }
   0xb   : > { %s339_s24 = scalar_select %p338_p3, %s923_s22, 0 }
   0xc   : > { %s348_s25 = scalar_select %p347_p4, %s929_s23, 0 }
   0xd   : > { %s1003_s24 = smov (!%p338_p3, %s339_s24), 0 }
   0xe   : > { %s752_s26 = sshll.u32 %s348_s25, 1  ;;  %s750_s27 = sshll.u32 %s1003_s24, 2 }
   0xf   : > { %p354_p5 = scmp.lt.s32.totalorder %s752_s26, 2  ;;  %s343_s30 = scalar_lea.vmem %s995_s0, %s750_s27 }
  0x10   : > { %s757_s7 = sshll.u32 %s1003_s24, 3  ;;  %p378_p6 = scmp.lt.s32.totalorder %s752_s26, 3 }
  0x11   : > { %s355_s8 = scalar_select %p354_p5, %s752_s26, 2 }
  0x12   : > { %s940_s11 = scalar_lea.vmem %s999_s4, %s757_s7  ;;  %s1005_s26 = smov (!%p378_p6, %s752_s26), 3 }
  0x13   : > { %s753_s12 = sshll.u32 %s355_s8, 2  ;;  %s760_s16 = sshll.u32 %s1005_s26, 3 }
  0x14   : > { %s945_s15 = scalar_lea.vmem %s996_s1, %s753_s12  ;;  %s950_s19 = scalar_lea.vmem %s1000_s5, %s760_s16 }
  0x15   : > { %390 = sbr.rel (%p761_p7) target bundleno = 31 (0x1f), region = 48 }
  0x1a   : > { %vm391_vm0 = vcmask 7168   ;;  %v876_v0 = vmov 0.0  }
  0x1b   : > { %392 = vst.msk [vmem:[#allocation2] sm:$0xff] %vm391_vm0, %v876_v0 }
  0x1c   : > { %393 = vst.msk [vmem:[#allocation2 + $0x8] sm:$0xff] %vm391_vm0, %v876_v0 }
  0x1d   : > { %394 = vst.msk [vmem:[#allocation3] sm:$0xff] %vm391_vm0, %v876_v0 }
  0x1e   : > { %395 = vst.msk [vmem:[#allocation3 + $0x8] sm:$0xff] %vm391_vm0, %v876_v0 }
  0x1f PF: > { %p762_p8 = scmp.ge.s32.totalorder %s923_s22, 1 }
  0x20   : > { %s763_s25 = sshll.u32 (!%p762_p8), %s923_s22, 3 }
  0x21   : > { %399 = sbr.rel (%p762_p8) target bundleno = 436 (0x1b4), region = 52 }
  0x26   : > { %v794_v1 = vld [vmem:[%s997_s2 + $0x8] sm:$0xff]  ;;  %v402_v2 = vlaneseq  ;;  %v405_v3 = vstv %s763_s25  ;;  %v793_v4 = vld [vmem:[%s997_s2] sm:$0xff]  ;;  %vm432_vm2 = vcmask 261120   ;;  %v877_v9 = vmov 0   ;;  %v478_v22 = vld [vmem:[#allocation3] sm:$0xff] }
  0x27   : > { %442 = vmatpush.bf16.msra.mxu0 %v794_v1  ;;  %v400_v7 = vld [vmem:[%s343_s30] sm:$0xf]  ;;  %817 = vset.pattern.permute.xlu0 %v877_v9  ;;  %v878_v23 = vmov 0.0   ;;  %vm476_vm7 = vcmask 7168  }
  0x28   : > { %v403_v5 = vshrl.u32 %v402_v2, 7  ;;  %v818_v10 = vld [vmem:[%s998_s3] ss:$0 sm:$0xff]  ;;  %v460_v19 = vand.u32 127, %v402_v2 }
  0x29   : > { %v401_v14 = vld [vmem:[%s940_s11] sm:$0xff] }
  0x2a   : > { %v406_v6 = vadd.s32 %v405_v3, %v403_v5  ;;  %vm469_vm5 = vcmp.ne.s32.totalorder %v401_v14, 0  ;;  %v473_v32 = vld [vmem:[#allocation2] sm:$0xff] }
  0x2b   : > { %443 = vmatpush.bf16.msra.mxu0 %v793_v4 }
  0x2c   : > { %vm407_vm1 = vcmp.lt.s32.totalorder %v406_v6, 8 }
  0x2d   : > { %vm410_vm3 = vmpackc.low %vm407_vm1, %vm407_vm1 }
  0x2e   : > { %v411_v8 = vsel %vm410_vm3, %v400_v7, 0  ;;  %vm470_vm6 = vmand %vm469_vm5, %vm407_vm1 }
  0x2f   : > { %772 = vmatmul.msk.bf16.vlgmr.msra.gmra.mxu0 %vm432_vm2, %v411_v8  ;;  %v773_v24 = vsel %vm470_vm6, 1.0, %v878_v23 }
  0x30   : > { %v479_v25 = vadd.f32 %v773_v24, %v478_v22 }
  0x32   : > { %480 = vst.msk [vmem:[#allocation3] sm:$0xff] %vm476_vm7, %v479_v25 }
  0xac   : > { %v445_v11 = vpop.f32.mrf.mxu0 }
  0xad   : > { %v446_v12 = vadd.f32 %v818_v10, %v445_v11 }
  0xaf   : > { %449 = vmax.xlane.f32.xlu0 %v446_v12 }
  0xb4   : > { %v447_v13 = vpop.f32.mrf.mxu0 }
  0xc3   : > { %462 = vperm.xlu0 %817, %v401_v14  }
 0x122   : > { %v450_v15 = vpop.xlane.xlu0 %449 }
 0x123   : > { %v451_v16 = vsub.f32 %v446_v12, %v450_v15 }
 0x125   : > { %v452_v17 = vmul.f32 1.442695, %v451_v16 }
 0x127   : > { %819 = vpow2.f32 %v452_v17 }
 0x12d   : > { %v820_v18 = vpop.eup %819 }
 0x12e   : > { %454 = vadd.xlane.f32.xlu1 %v820_v18 }
 0x135   : > { %v463_v20 = vpop.permute.xlu0 %462 }
 0x136   : > { %vm464_vm4 = vcmp.eq.s32.totalorder %v460_v19, %v463_v20 }
 0x137   : > { %v465_v21 = vsel %vm464_vm4, %v446_v12, 0.0 }
 0x138   : > { %466 = vadd.xlane.f32.xlu1 %v465_v21 }
 0x1a1   : > { %v455_v26 = vpop.xlane.xlu1 %454 }
 0x1a2   : > { %821 = vlog2.f32 %v455_v26 }
 0x1a8   : > { %v822_v27 = vpop.eup %821 }
 0x1a9   : > { %v457_v28 = vmul.f32 0.6931472, %v822_v27 }
 0x1ab   : > { %v458_v29 = vadd.f32 %v457_v28, %v450_v15  ;;  %v467_v30 = vpop.xlane.xlu1 %466 }
 0x1ad   : > { %v468_v31 = vsub.f32 %v458_v29, %v467_v30 }
 0x1af   : > { %v474_v33 = vmul.f32 %v773_v24, %v468_v31 }
 0x1b1   : > { %v475_v34 = vadd.f32 %v474_v33, %v473_v32 }
 0x1b3   : > { %477 = vst.msk [vmem:[#allocation2] sm:$0xff] %vm476_vm7, %v475_v34 }
 0x1b4 PF: > { %p774_p9 = scmp.lt.s32.totalorder %s923_s22, 1 }
 0x1b5   : > { %s776_s8 = sshll.u32 (!%p774_p9), %s929_s23, 4 }
 0x1b6   : > { %484 = sbr.rel (%p774_p9) target bundleno = 855 (0x357), region = 56 }
 0x1bb   : > { %v796_v35 = vld [vmem:[%s997_s2 + $0x8] sm:$0xff]  ;;  %v490_v36 = vlaneseq  ;;  %v494_v37 = vstv %s776_s8  ;;  %v487_v38 = vld [vmem:[%s950_s19] sm:$0xff]  ;;  %v879_v41 = vmov 0   ;;  %v605_v48 = vld [vmem:[#allocation3] sm:$0xff]  ;;  %v880_v51 = vmov 0.0  }
 0x1bc   : > { %542 = vmatpush.bf16.msra.mxu0 %v796_v35  ;;  %v795_v39 = vld [vmem:[%s997_s2] sm:$0xff]  ;;  %823 = vset.pattern.permute.xlu1 %v879_v41  ;;  %vm588_vm8 = vcmp.ne.s32.totalorder %v487_v38, 0  ;;  %v488_v46 = vld [vmem:[%s950_s19 + $0x8] sm:$0xff]  ;;  %v606_v53 = vld [vmem:[#allocation3 + $0x8] sm:$0xff]  ;;  %vm602_vm0 = vcmask 7168   ;;  %vm532_vm1 = vcmask 261120  }
 0x1bd   : > { %v491_v40 = vshrl.u32 %v490_v36, 7  ;;  %573 = vperm.xlu1 %823, %v487_v38   ;;  %824 = vset.pattern.permute.xlu0 %v879_v41  ;;  %v485_v44 = vld [vmem:[%s945_s15] sm:$0xf]  ;;  %v486_v47 = vld [vmem:[%s945_s15 + $0x4] sm:$0xf]  ;;  %vm589_vm11 = vcmp.ne.s32.totalorder %v488_v46, 0 }
 0x1be   : > { %v825_v61 = vld [vmem:[%s998_s3] ss:$0 sm:$0xff]  ;;  %v571_v1 = vand.u32 127, %v490_v36  ;;  %v597_v29 = vld [vmem:[#allocation2 + $0x8] sm:$0xff] }
 0x1bf   : > { %v492_v42 = vadd.s32 8, %v491_v40  ;;  %v495_v43 = vadd.s32 %v494_v37, %v491_v40  ;;  %v596_v21 = vld [vmem:[#allocation2] sm:$0xff] }
 0x1c0   : > { %543 = vmatpush.bf16.msra.mxu0 %v795_v39 }
 0x1c1   : > { %v496_v45 = vadd.s32 %v494_v37, %v492_v42  ;;  %vm497_vm9 = vcmp.lt.s32.totalorder %v495_v43, 18 }
 0x1c2   : > { %vm503_vm10 = vmpackc.low %vm497_vm9, %vm497_vm9 }
 0x1c3   : > { %vm498_vm12 = vcmp.lt.s32.totalorder %v496_v45, 18  ;;  %v505_v49 = vsel %vm503_vm10, %v485_v44, 0  ;;  %vm590_vm13 = vmand %vm588_vm8, %vm497_vm9 }
 0x1c4   : > { %vm504_vm14 = vmpackc.low %vm498_vm12, %vm498_vm12  ;;  %v517_v50 = vunpack.c.l.b16 %v505_v49  ;;  %v786_v52 = vsel %vm590_vm13, 1.0, %v880_v51 }
 0x1c5   : > { %v506_v54 = vsel %vm504_vm14, %v486_v47, 0  ;;  %v607_v55 = vadd.f32 %v786_v52, %v605_v48  ;;  %vm591_vm15 = vmand %vm589_vm11, %vm498_vm12  ;;  %576 = vperm.xlu1 %823, %v488_v46  }
 0x1c6   : > { %v518_v56 = vunpack.c.l.b16 %v506_v54  ;;  %v787_v57 = vsel %vm591_vm15, 1.0, %v880_v51 }
 0x1c7   : > { %609 = vst.msk [vmem:[#allocation3] sm:$0xff] %vm602_vm0, %v607_v55  ;;  %v608_v58 = vadd.f32 %v787_v57, %v606_v53 }
 0x1c8   : > { %v519_v59 = vpack.c.b16 %v518_v56, %v517_v50 }
 0x1c9   : > { %610 = vst.msk [vmem:[#allocation3 + $0x8] sm:$0xff] %vm602_vm0, %v608_v58 }
 0x1ca   : > { %785 = vmatmul.msk.bf16.vlgmr.msra.gmra.mxu0 %vm532_vm1, %v519_v59 }
 0x22f   : > { %v574_v60 = vpop.permute.xlu1 %573 }
 0x230   : > { %vm578_vm3 = vcmp.eq.s32.totalorder %v571_v1, %v574_v60 }
 0x237   : > { %v577_v0 = vpop.permute.xlu1 %576 }
 0x238   : > { %vm579_vm2 = vcmp.eq.s32.totalorder %v571_v1, %v577_v0 }
 0x247   : > { %v545_v62 = vpop.f32.mrf.mxu0 }
 0x248   : > { %v546_v63 = vadd.f32 %v825_v61, %v545_v62 }
 0x24a   : > { %550 = vmax.xlane.f32.xlu0 %v546_v63  ;;  %v580_v5 = vsel %vm578_vm3, %v546_v63, 0.0 }
 0x24f   : > { %v547_v2 = vpop.f32.mrf.mxu0 }
 0x250   : > { %v548_v3 = vadd.f32 %v825_v61, %v547_v2 }
 0x252   : > { %552 = vmax.xlane.f32.xlu0 %v548_v3  ;;  %v581_v4 = vsel %vm579_vm2, %v548_v3, 0.0 }
 0x253   : > { %584 = vadd.xlane.f32.xlu1 %v581_v4 }
 0x25a   : > { %582 = vadd.xlane.f32.xlu0 %v580_v5 }
 0x2bd   : > { %v551_v6 = vpop.xlane.xlu0 %550 }
 0x2be   : > { %v554_v7 = vsub.f32 %v546_v63, %v551_v6 }
 0x2c0   : > { %v556_v8 = vmul.f32 1.442695, %v554_v7 }
 0x2c2   : > { %826 = vpow2.f32 %v556_v8 }
 0x2c5   : > { %v553_v9 = vpop.xlane.xlu0 %552 }
 0x2c6   : > { %v555_v10 = vsub.f32 %v548_v3, %v553_v9  ;;  %v585_v27 = vpop.xlane.xlu1 %584 }
 0x2c8   : > { %v827_v11 = vpop.eup %826  ;;  %v558_v12 = vmul.f32 1.442695, %v555_v10 }
 0x2c9   : > { %560 = vadd.xlane.f32.xlu2 %v827_v11 }
 0x2ca   : > { %828 = vpow2.f32 %v558_v12 }
 0x2cd   : > { %v583_v19 = vpop.xlane.xlu0 %582 }
 0x2d0   : > { %v829_v13 = vpop.eup %828 }
 0x2d1   : > { %562 = vadd.xlane.f32.xlu2 %v829_v13 }
 0x33c   : > { %v561_v14 = vpop.xlane.xlu2 %560 }
 0x33d   : > { %830 = vlog2.f32 %v561_v14 }
 0x343   : > { %v831_v15 = vpop.eup %830 }
 0x344   : > { %v565_v16 = vmul.f32 0.6931472, %v831_v15  ;;  %v563_v17 = vpop.xlane.xlu2 %562 }
 0x345   : > { %832 = vlog2.f32 %v563_v17 }
 0x346   : > { %v568_v18 = vadd.f32 %v565_v16, %v551_v6 }
 0x348   : > { %v586_v20 = vsub.f32 %v568_v18, %v583_v19 }
 0x34a   : > { %v598_v22 = vmul.f32 %v786_v52, %v586_v20 }
 0x34b   : > { %v833_v23 = vpop.eup %832 }
 0x34c   : > { %v600_v24 = vadd.f32 %v598_v22, %v596_v21  ;;  %v567_v25 = vmul.f32 0.6931472, %v833_v23 }
 0x34e   : > { %603 = vst.msk [vmem:[#allocation2] sm:$0xff] %vm602_vm0, %v600_v24  ;;  %v569_v26 = vadd.f32 %v567_v25, %v553_v9 }
 0x350   : > { %v587_v28 = vsub.f32 %v569_v26, %v585_v27 }
 0x352   : > { %v599_v30 = vmul.f32 %v787_v57, %v587_v28 }
 0x354   : > { %v601_v31 = vadd.f32 %v599_v30, %v597_v29 }
 0x356   : > { %604 = vst.msk [vmem:[#allocation2 + $0x8] sm:$0xff] %vm602_vm0, %v601_v31 }
 0x357 PF: > { %p788_p10 = scmp.ne.s32.totalorder %s923_s22, 2 }
 0x359   : > { %614 = sbr.rel (%p788_p10) target bundleno = 899 (0x383), region = 60 }
 0x35e   : > { %v615_v32 = vld [vmem:[#allocation2] sm:$0xff]  ;;  %v616_v33 = vld [vmem:[#allocation2 + $0x8] sm:$0xff]  ;;  %vm617_vm4 = vcmask 7168   ;;  %v627_v34 = vld [vmem:[#allocation3] sm:$0xff]  ;;  %vm653_vm9 = vcmask 0  }
 0x35f   : > { %v628_v35 = vld [vmem:[#allocation3 + $0x8] sm:$0xff]  ;;  %v629_v36 = vsel %vm617_vm4, %v627_v34, 0.0  ;;  %v618_v37 = vsel %vm617_vm4, %v615_v32, 0.0  ;;  %v619_v38 = vsel %vm617_vm4, %v616_v33, 0.0 }
 0x360   : > { %v630_v39 = vsel %vm617_vm4, %v628_v35, 0.0  ;;  %v620_v41 = vadd.f32 %v619_v38, %v618_v37 }
 0x361   : > { %v631_v40 = vadd.f32 %v630_v39, %v629_v36 }
 0x362   : > { %v621_v44 = vrot.slane %v620_v41, 4 }
 0x363   : > { %v632_v42 = vrot.slane %v631_v40, 4 }
 0x364   : > { %v622_v47 = vadd.f32 %v621_v44, %v620_v41 }
 0x365   : > { %v633_v43 = vadd.f32 %v632_v42, %v631_v40 }
 0x366   : > { %v623_v50 = vrot.slane %v622_v47, 2 }
 0x367   : > { %v634_v45 = vrot.slane %v633_v43, 2 }
 0x368   : > { %v624_v51 = vadd.f32 %v623_v50, %v622_v47 }
 0x369   : > { %v635_v46 = vadd.f32 %v634_v45, %v633_v43 }
 0x36a   : > { %v625_v54 = vrot.slane %v624_v51, 1 }
 0x36b   : > { %v636_v48 = vrot.slane %v635_v46, 1 }
 0x36c   : > { %v626_v60 = vadd.f32 %v625_v54, %v624_v51 }
 0x36d   : > { %v637_v49 = vadd.f32 %v636_v48, %v635_v46 }
 0x36f   : > { %834 = vrcp.f32 %v637_v49  ;;  %v649_v55 = vand.u32 2147483648, %v637_v49  ;;  %vm643_vm5 = vweird.f32 %v637_v49  ;;  %v647_v57 = vand.u32 2147483647, %v637_v49 }
 0x371   : > { %v650_v59 = vor.u32 1.1754944e-38, %v649_v55  ;;  %vm648_vm8 = vcmp.eq.f32.partialorder %v647_v57, 8.507059e+37 }
 0x375   : > { %v835_v52 = vpop.eup %834 }
 0x376   : > { %v639_v53 = vmul.f32 %v835_v52, %v637_v49  ;;  %vm644_vm6 = vweird.f32 %v835_v52 }
 0x377   : > { %vm645_vm7 = vmor %vm643_vm5, %vm644_vm6 }
 0x378   : > { %v640_v56 = vsub.f32 1.0, %v639_v53 }
 0x37a   : > { %v641_v58 = vmul.f32 %v835_v52, %v640_v56 }
 0x37c   : > { %v642_v61 = vadd.f32 %v835_v52, %v641_v58 }
 0x37e   : > { %v646_v62 = vsel %vm645_vm7, %v835_v52, %v642_v61 }
 0x37f   : > { %v651_v63 = vsel %vm648_vm8, %v650_v59, %v646_v62 }
 0x380   : > { %v652_v0 = vmul.f32 %v651_v63, %v626_v60 }
 0x382   : > { %654 = vst.msk [vmem:[#allocation4] sm:$0x1] %vm653_vm9, %v652_v0 }
 0x383 PF: > { %p801_p11 = scmp.eq.s32.totalorder %s923_s22, 2  ;;  %s881_s12 = smov [#allocation4]  }
 0x384   : > { %s661_s13 = sshll.u32 %s881_s12, 4  ;;  %s663_s16 = sshll.u32 %s1001_s6, 4  ;;  %s662_s13 = int_to_ptr.vmem [resolvable:$true] %s661_s13  ;;  %s664_s16 = int_to_ptr.hbm [resolvable:$true] %s663_s16 }
 0x385   : > { %798 = dma.vmem_to_hbm [thread:$0]  (%p801_p11), %s662_s13, 16, %s664_s16, [#allocation5]  }
 0x386   : > { %869 = dma.done.wait (%p801_p11), [#allocation5], 16  }
 0x387   : > { %871 = vsyncadd (%p801_p11), [#allocation5], 4294967280 }
 0x388 PF: > { %s17_s21 = sadd.s32 1, %s874_s21  }
 0x389   : > { %p14_p12 = scmp.ge.s32.totalorder %s17_s21, 5  }
 0x38b   :  { %16 = sbr.rel (!%p14_p12) target bundleno = 1 (0x1), region = 96 }
 0x390   :  { %677 = vsyncpa [#allocation5], 1 }
 0x391   :  { %679 = vsyncpa [#allocation5 + $0x1], 1 }

</bundles_post_ra>
